<compile_context>
chip_gen: v6e
topology: v6e:2x2x1
jax: 0.10.0
libtpu: 0.0.40
codegen_flags: <defaults>
</compile_context>

<pallas_src>
import functools
import math

import jax
import jax.numpy as jnp
from jax.experimental import pallas as pl
from jax.experimental.pallas import tpu as pltpu


def _sdpa_kernel(q_ref, k_ref, v_ref, mask_ref, ctx_ref, attn_ref, *,
                 scale, mxu_dtype):
    # q_ref:    (1, 1, Tq, D)   k_ref/v_ref: (1, 1, S, D)
    # mask_ref: (1, 1, Tq, S) int8 (nonzero == masked)
    # ctx_ref:  (1, 1, Tq, D)   attn_ref:    (1, 1, Tq, S)
    q = q_ref[0, 0]       # (Tq, D)
    k = k_ref[0, 0]       # (S, D)
    v = v_ref[0, 0]       # (S, D)
    mask = mask_ref[0, 0]  # (Tq, S) int8

    # Fold 1/sqrt(d_k) into Q: scales Tq*D elements instead of Tq*S scores.
    q = q.astype(jnp.float32) * scale
    if mxu_dtype is not None:
        q = q.astype(mxu_dtype)
        k = k.astype(mxu_dtype)

    # scores = Q @ K^T, contracting the last dims directly (no k.T relayout),
    # f32 accumulation on the MXU.
    scores = jax.lax.dot_general(
        q, k, dimension_numbers=(((1,), (1,)), ((), ())),
        preferred_element_type=jnp.float32)

    # masked_fill_(attn_mask, -1e9)
    scores = jnp.where(mask != 0, jnp.float32(-1e9), scores)

    # Numerically-stable softmax over the key axis (f32 throughout).
    m = jnp.max(scores, axis=-1, keepdims=True)
    e = jnp.exp(scores - m)
    denom = jnp.sum(e, axis=-1, keepdims=True)        # >= 1, never zero
    # EUP approximate reciprocal + one Newton refinement (near-exact f32).
    r = pl.reciprocal(denom, approx=True)
    r = r * (2.0 - denom * r)
    attn = e * r

    attn_ref[0, 0] = attn.astype(attn_ref.dtype)

    # context = attn @ V (f32 accumulation on the MXU).
    p_dtype = mxu_dtype if mxu_dtype is not None else v.dtype
    ctx = jnp.dot(attn.astype(p_dtype), v.astype(p_dtype),
                  preferred_element_type=jnp.float32)
    ctx_ref[0, 0] = ctx.astype(ctx_ref.dtype)


def scaled_dot_product_attention(Q, K, V, attn_mask, d_k, *, mxu_dtype=None):
    """Q,K,V: [B,H,S,d_k]; attn_mask: bool [S,S] or [B,H,S,S] (True == masked).

    Returns (context [B,H,S,d_k], attn [B,H,S,S]).
    Set mxu_dtype=jnp.bfloat16 to feed the MXU bf16 inputs (v6e/v7x peak rate);
    softmax and accumulation remain float32.
    """
    B, H, S, D = Q.shape
    assert K.shape == (B, H, S, D) and V.shape == (B, H, S, D)

    if attn_mask.ndim == 2:
        attn_mask = attn_mask[None, None]
    MB, MH, MSq, MSk = attn_mask.shape
    assert MSq == S and MSk == S and MB in (1, B) and MH in (1, H)
    # int8 mask: 1/4 the HBM bytes of int32, and not replicated when shared.
    mask_i8 = attn_mask.astype(jnp.int8)

    # Query-tile size: keeps VMEM footprint O(Tq*S), lane/sublane friendly.
    if S % 256 == 0:
        tq = 256
    elif S % 128 == 0:
        tq = 128
    else:
        tq = S            # full extent -> satisfies the (8,128) tiling rule
    nq = S // tq

    scale = 1.0 / math.sqrt(float(d_k))
    kernel = functools.partial(_sdpa_kernel, scale=scale, mxu_dtype=mxu_dtype)

    q_spec = pl.BlockSpec((1, 1, tq, D), lambda b, h, qi: (b, h, qi, 0))
    # K/V block index ignores qi -> unchanged between consecutive qi steps,
    # so the pipeline does not re-DMA them while sweeping the query tiles.
    kv_spec = pl.BlockSpec((1, 1, S, D), lambda b, h, qi: (b, h, 0, 0))
    mb = (lambda b: b) if MB > 1 else (lambda b: 0)
    mh = (lambda h: h) if MH > 1 else (lambda h: 0)
    mask_spec = pl.BlockSpec((1, 1, tq, S),
                             lambda b, h, qi: (mb(b), mh(h), qi, 0))
    attn_spec = pl.BlockSpec((1, 1, tq, S), lambda b, h, qi: (b, h, qi, 0))

    context, attn = pl.pallas_call(
        kernel,
        out_shape=(
            jax.ShapeDtypeStruct((B, H, S, D), Q.dtype),
            jax.ShapeDtypeStruct((B, H, S, S), Q.dtype),
        ),
        grid_spec=pltpu.PrefetchScalarGridSpec(
            num_scalar_prefetch=0,
            grid=(B, H, nq),
            in_specs=[q_spec, kv_spec, kv_spec, mask_spec],
            out_specs=[q_spec, attn_spec],
        ),
        compiler_params=pltpu.CompilerParams(
            # (B, H) parallel -> shards across the 2 TCs on v7x megacore.
            dimension_semantics=("parallel", "parallel", "arbitrary"),
            # Explicit VMEM budget; safe on v5e/v6e (128 MiB) and v7x (64 MiB).
            vmem_limit_bytes=48 * 1024 * 1024,
        ),
    )(Q, K, V, mask_i8)
    return context, attn


def _reference(Q, K, V, attn_mask, d_k):
    scores = jnp.einsum("bhqd,bhkd->bhqk", Q, K) / jnp.sqrt(jnp.float32(d_k))
    scores = jnp.where(attn_mask, jnp.float32(-1e9), scores)
    attn = jax.nn.softmax(scores, axis=-1)
    context = jnp.einsum("bhqk,bhkd->bhqd", attn, V)
    return context, attn


if __name__ == "__main__":
    B, H, S, d_k = 2, 4, 8, 32

    key = jax.random.PRNGKey(0)
    kq, kk, kv = jax.random.split(key, 3)
    Q = jax.random.normal(kq, (B, H, S, d_k), dtype=jnp.float32)
    K = jax.random.normal(kk, (B, H, S, d_k), dtype=jnp.float32)
    V = jax.random.normal(kv, (B, H, S, d_k), dtype=jnp.float32)
    # Deterministic causal mask, shared across (B, H): passed as [S, S] so it
    # is never materialized as [B, H, S, S] in HBM.
    causal_mask = jnp.triu(jnp.ones((S, S), dtype=jnp.bool_), k=1)

    # f32 path (bit-for-bit module semantics).
    context, attn = scaled_dot_product_attention(Q, K, V, causal_mask, d_k)
    jax.block_until_ready((context, attn))

    mask_full = jnp.broadcast_to(causal_mask, (B, H, S, S))
    ref_ctx, ref_attn = _reference(Q, K, V, mask_full, d_k)
    assert jnp.allclose(context, ref_ctx, atol=1e-4, rtol=1e-4)
    assert jnp.allclose(attn, ref_attn, atol=1e-4, rtol=1e-4)

    # bf16-MXU path (v6e/v7x fast path): softmax stays f32, matmul inputs bf16.
    ctx_bf16, attn_bf16 = scaled_dot_product_attention(
        Q, K, V, causal_mask, d_k, mxu_dtype=jnp.bfloat16)
    jax.block_until_ready((ctx_bf16, attn_bf16))
    assert jnp.allclose(ctx_bf16, ref_ctx, atol=5e-2, rtol=5e-2)
    assert jnp.allclose(attn_bf16, ref_attn, atol=5e-2, rtol=5e-2)

    print("KERNEL_OK")
</pallas_src>

<mosaic_0001>
module attributes {stable_mosaic.version = 11 : i64} {
  func.func @_sdpa_kernel(%arg0: i32, %arg1: i32, %arg2: i32, %arg3: memref<1x1x8x32xf32, #tpu.memory_space<vmem>>, %arg4: memref<1x1x8x32xf32, #tpu.memory_space<vmem>>, %arg5: memref<1x1x8x32xf32, #tpu.memory_space<vmem>>, %arg6: memref<1x1x8x8xi8, #tpu.memory_space<vmem>>, %arg7: memref<1x1x8x32xf32, #tpu.memory_space<vmem>>, %arg8: memref<1x1x8x8xf32, #tpu.memory_space<vmem>>) attributes {dimension_semantics = [#tpu.dimension_semantics<parallel>, #tpu.dimension_semantics<parallel>, #tpu.dimension_semantics<arbitrary>], iteration_bounds = array<i64: 2, 4, 1>, scalar_prefetch = 0 : i64, scratch_operands = 0 : i64, tpu.core_type = #tpu.core_type<tc>, window_params = [{transform_indices = @transform_0, window_bounds = array<i64: 1, 1, 8, 32>}, {transform_indices = @transform_1, window_bounds = array<i64: 1, 1, 8, 32>}, {transform_indices = @transform_2, window_bounds = array<i64: 1, 1, 8, 32>}, {transform_indices = @transform_3, window_bounds = array<i64: 1, 1, 8, 8>}, {transform_indices = @transform_4, window_bounds = array<i64: 1, 1, 8, 32>}, {transform_indices = @transform_5, window_bounds = array<i64: 1, 1, 8, 8>}]} {
    %c0 = arith.constant 0 : index
    %c0_0 = arith.constant 0 : index
    %c0_1 = arith.constant 0 : index
    %c0_2 = arith.constant 0 : index
    %0 = vector.load %arg3[%c0, %c0_0, %c0_1, %c0_2] : memref<1x1x8x32xf32, #tpu.memory_space<vmem>>, vector<1x1x8x32xf32>
    %1 = vector.shape_cast %0 : vector<1x1x8x32xf32> to vector<8x32xf32>
    %c0_3 = arith.constant 0 : index
    %c0_4 = arith.constant 0 : index
    %c0_5 = arith.constant 0 : index
    %c0_6 = arith.constant 0 : index
    %2 = vector.load %arg4[%c0_3, %c0_4, %c0_5, %c0_6] : memref<1x1x8x32xf32, #tpu.memory_space<vmem>>, vector<1x1x8x32xf32>
    %3 = vector.shape_cast %2 : vector<1x1x8x32xf32> to vector<8x32xf32>
    %c0_7 = arith.constant 0 : index
    %c0_8 = arith.constant 0 : index
    %c0_9 = arith.constant 0 : index
    %c0_10 = arith.constant 0 : index
    %4 = vector.load %arg5[%c0_7, %c0_8, %c0_9, %c0_10] : memref<1x1x8x32xf32, #tpu.memory_space<vmem>>, vector<1x1x8x32xf32>
    %5 = vector.shape_cast %4 : vector<1x1x8x32xf32> to vector<8x32xf32>
    %c0_11 = arith.constant 0 : index
    %c0_12 = arith.constant 0 : index
    %c0_13 = arith.constant 0 : index
    %c0_14 = arith.constant 0 : index
    %6 = vector.load %arg6[%c0_11, %c0_12, %c0_13, %c0_14] : memref<1x1x8x8xi8, #tpu.memory_space<vmem>>, vector<1x1x8x8xi8>
    %7 = vector.shape_cast %6 : vector<1x1x8x8xi8> to vector<8x8xi8>
    %cst = arith.constant 0.176776692 : f32
    %8 = vector.broadcast %cst : f32 to vector<8x32xf32>
    %9 = arith.mulf %1, %8 : vector<8x32xf32>
    %cst_15 = arith.constant dense<0.000000e+00> : vector<8x8xf32>
    %10 = tpu.matmul %9, %3, %cst_15 {dimension_numbers = #tpu.dot_dimension_numbers<[1], [1], [0], [0], [0, 0, 1, 0], [], []>} : vector<8x32xf32>, vector<8x32xf32>, vector<8x8xf32> -> vector<8x8xf32>
    %c0_i8 = arith.constant 0 : i8
    %11 = vector.broadcast %c0_i8 : i8 to vector<8x8xi8>
    %12 = arith.cmpi ne, %7, %11 : vector<8x8xi8>
    %cst_16 = arith.constant -1.000000e+09 : f32
    %13 = vector.broadcast %cst_16 : f32 to vector<8x8xf32>
    %14 = arith.select %12, %13, %10 : vector<8x8xi1>, vector<8x8xf32>
    %cst_17 = arith.constant dense<0xFF800000> : vector<8xf32>
    %15 = vector.multi_reduction <maximumf>, %14, %cst_17 [1] : vector<8x8xf32> to vector<8xf32>
    %16 = vector.shape_cast %15 : vector<8xf32> to vector<8x1xf32>
    %17 = vector.broadcast %16 : vector<8x1xf32> to vector<8x8xf32>
    %18 = arith.subf %14, %17 : vector<8x8xf32>
    %19 = math.exp %18 : vector<8x8xf32>
    %cst_18 = arith.constant dense<0.000000e+00> : vector<8xf32>
    %20 = vector.multi_reduction <add>, %19, %cst_18 [1] : vector<8x8xf32> to vector<8xf32>
    %21 = vector.shape_cast %20 : vector<8xf32> to vector<8x1xf32>
    %22 = tpu.reciprocal %21 {approx = true} : vector<8x1xf32> -> vector<8x1xf32>
    %23 = arith.mulf %21, %22 : vector<8x1xf32>
    %cst_19 = arith.constant 2.000000e+00 : f32
    %24 = vector.broadcast %cst_19 : f32 to vector<8x1xf32>
    %25 = arith.subf %24, %23 : vector<8x1xf32>
    %26 = arith.mulf %22, %25 : vector<8x1xf32>
    %27 = vector.broadcast %26 : vector<8x1xf32> to vector<8x8xf32>
    %28 = arith.mulf %19, %27 : vector<8x8xf32>
    %c0_20 = arith.constant 0 : index
    %c0_21 = arith.constant 0 : index
    %c0_22 = arith.constant 0 : index
    %c0_23 = arith.constant 0 : index
    %29 = vector.load %arg8[%c0_20, %c0_21, %c0_22, %c0_23] : memref<1x1x8x8xf32, #tpu.memory_space<vmem>>, vector<1x1x8x8xf32>
    %30 = vector.shape_cast %29 : vector<1x1x8x8xf32> to vector<8x8xf32>
    %31 = vector.shape_cast %28 : vector<8x8xf32> to vector<1x1x8x8xf32>
    tpu.vector_store %arg8[%c0_20, %c0_21, %c0_22, %c0_23], %31 {strides = array<i32>} : memref<1x1x8x8xf32, #tpu.memory_space<vmem>>, vector<1x1x8x8xf32>,
    %cst_24 = arith.constant dense<0.000000e+00> : vector<8x32xf32>
    %32 = tpu.matmul %28, %5, %cst_24 {dimension_numbers = #tpu.dot_dimension_numbers<[1], [0], [0], [1], [0, 0, 1, 1], [], []>} : vector<8x8xf32>, vector<8x32xf32>, vector<8x32xf32> -> vector<8x32xf32>
    %c0_25 = arith.constant 0 : index
    %c0_26 = arith.constant 0 : index
    %c0_27 = arith.constant 0 : index
    %c0_28 = arith.constant 0 : index
    %33 = vector.load %arg7[%c0_25, %c0_26, %c0_27, %c0_28] : memref<1x1x8x32xf32, #tpu.memory_space<vmem>>, vector<1x1x8x32xf32>
    %34 = vector.shape_cast %33 : vector<1x1x8x32xf32> to vector<8x32xf32>
    %35 = vector.shape_cast %32 : vector<8x32xf32> to vector<1x1x8x32xf32>
    tpu.vector_store %arg7[%c0_25, %c0_26, %c0_27, %c0_28], %35 {strides = array<i32>} : memref<1x1x8x32xf32, #tpu.memory_space<vmem>>, vector<1x1x8x32xf32>,
    return
  }
  func.func @transform_0(%arg0: i32, %arg1: i32, %arg2: i32) -> (i32, i32, i32, i32) {
    %c0_i32 = arith.constant 0 : i32
    %c0_i32_0 = arith.constant 0 : i32
    return %arg0, %arg1, %arg2, %c0_i32 : i32, i32, i32, i32
  }
  func.func @transform_1(%arg0: i32, %arg1: i32, %arg2: i32) -> (i32, i32, i32, i32) {
    %c0_i32 = arith.constant 0 : i32
    %c0_i32_0 = arith.constant 0 : i32
    %c0_i32_1 = arith.constant 0 : i32
    return %arg0, %arg1, %c0_i32, %c0_i32_0 : i32, i32, i32, i32
  }
  func.func @transform_2(%arg0: i32, %arg1: i32, %arg2: i32) -> (i32, i32, i32, i32) {
    %c0_i32 = arith.constant 0 : i32
    %c0_i32_0 = arith.constant 0 : i32
    %c0_i32_1 = arith.constant 0 : i32
    return %arg0, %arg1, %c0_i32, %c0_i32_0 : i32, i32, i32, i32
  }
  func.func @transform_3(%arg0: i32, %arg1: i32, %arg2: i32) -> (i32, i32, i32, i32) {
    %c0_i32 = arith.constant 0 : i32
    %c0_i32_0 = arith.constant 0 : i32
    %c0_i32_1 = arith.constant 0 : i32
    %c0_i32_2 = arith.constant 0 : i32
    return %c0_i32, %c0_i32_0, %arg2, %c0_i32_1 : i32, i32, i32, i32
  }
  func.func @transform_4(%arg0: i32, %arg1: i32, %arg2: i32) -> (i32, i32, i32, i32) {
    %c0_i32 = arith.constant 0 : i32
    %c0_i32_0 = arith.constant 0 : i32
    return %arg0, %arg1, %arg2, %c0_i32 : i32, i32, i32, i32
  }
  func.func @transform_5(%arg0: i32, %arg1: i32, %arg2: i32) -> (i32, i32, i32, i32) {
    %c0_i32 = arith.constant 0 : i32
    %c0_i32_0 = arith.constant 0 : i32
    return %arg0, %arg1, %arg2, %c0_i32 : i32, i32, i32, i32
  }
}

</mosaic_0001>

<bundles_post_ra>
// kernel: tpu_custom_call.1
= control target key start
LH: loop header
LB: loop body
LE: loop exit
PB: predicated region body
PF: predicated region fallthrough
CT: control target
= control target key end

     0   :  { %s1450_s0 = inlined_call_operand.hbm [shape: f32[2,4,8,32], index: 0, kind: input, shape index: {}]   ;;  %s1451_s1 = inlined_call_operand.hbm [shape: f32[2,4,8,32], index: 1, kind: input, shape index: {}]   ;;  %s1452_s2 = inlined_call_operand.hbm [shape: f32[2,4,8,32], index: 2, kind: input, shape index: {}]   ;;  %s1453_s3 = inlined_call_operand.vmem [shape: s8[1,1,8,8], index: 3, kind: input, shape index: {}]   ;;  %s1454_s4 = inlined_call_operand.hbm [shape: f32[2,4,8,32], index: 4, kind: output, shape index: {0}]   ;;  %s1455_s5 = inlined_call_operand.hbm [shape: f32[2,4,8,8], index: 5, kind: output, shape index: {1}]  }
   0x1   :  { %1463 = sst [smem:[#allocation22_spill]] %s1451_s1 }
   0x2   :  { %11 = vsyncpa [#allocation3], 0 }
   0x3   :  { %13 = vsyncpa [#allocation3 + $0x1], 0 }
   0x4   :  { %14 = vsyncpa [#allocation6], 0 }
   0x5   :  { %16 = vsyncpa [#allocation6 + $0x1], 0 }
   0x6   :  { %17 = vsyncpa [#allocation4], 0 }
   0x7   :  { %19 = vsyncpa [#allocation4 + $0x1], 0 }
   0x8   :  { %20 = vsyncpa [#allocation10], 0 }
   0x9   :  { %22 = vsyncpa [#allocation10 + $0x1], 0  ;;  %s1184_s18 = smov 0   ;;  %s1186_s19 = smov 0  }
   0xa   :  { %s1188_s20 = smov 0   ;;  %s1190_s21 = smov 0  }
   0xb   :  { %s1192_s22 = smov 0   ;;  %s1194_s23 = smov 0  }
   0xc   :  { %s1196_s24 = smov 0   ;;  %s1198_s25 = smov 0  }
   0xd LB: > { %1464 = sst [smem:[#allocation15_spill]] %s1116_s18  ;;  %s1225_s26 = sadd.s32 4294967295, %s1144_s25   ;;  %s1144_s25 = sphi %s1198_s25, %s28_s25   ;;  %s1140_s24 = sphi %s1196_s24, %s1485_s24   ;;  %s1136_s23 = sphi %s1194_s23, %s1484_s23   ;;  %s1132_s22 = sphi %s1192_s22, %s1483_s22   ;;  %s1128_s21 = sphi %s1190_s21, %s1482_s21   ;;  %s1124_s20 = sphi %s1188_s20, %s1488_s20   ;;  %s1120_s19 = sphi %s1186_s19, %s1487_s19   ;;  %s1116_s18 = sphi %s1184_s18, %s1486_s18  }
   0xe   : > { %1465 = sst [smem:[#allocation16_spill]] %s1136_s23  ;;  %s786_s27 = sadd.s32 4294967294, %s1144_s25  }
   0xf   : > { %1466 = sst [smem:[#allocation17_spill]] %s1140_s24  ;;  %s43_s28 = sadd.s32 1, %s1136_s23 }
  0x10   : > { %s47_s29 = sadd.s32 1, %s1140_s24  ;;  %p45_p0 = scmp.ge.s32.totalorder %s43_s28, 4 }
  0x11   : > { %s58_s30 = sadd.s32 1, %s1124_s20  ;;  %p65_p1 = scmp.ne.s32.totalorder %s1124_s20, %s1120_s19 }
  0x12   : > { %p66_p2 = scmp.eq.s32.totalorder %s1144_s25, 0  ;;  %s1490_s28 = smov (%p45_p0, %s43_s28), 0 }
  0x13   : > { %1467 = sst [smem:[#allocation18_spill]] %s1490_s28  ;;  %s1492_s29 = smov (!%p45_p0, %s47_s29), %s1140_s24 }
  0x14   : > { %s52_s6 = ssub.s32 %s1136_s23, %s1490_s28  ;;  %p1239_p3 = por %p66_p2, %p65_p1 }
  0x15   : > { %p49_p4 = scmp.ge.s32.totalorder %s1492_s29, 2  ;;  %p71_p5 = scmp.ne.s32.totalorder %s1120_s19, %s1116_s18 }
  0x16   : > { %p72_p6 = scmp.eq.s32.totalorder %s1225_s26, 0  ;;  %p181_p7 = scmp.eq.s32.totalorder %s1225_s26, 7 }
  0x17   : > { %s1494_s29 = smov (%p49_p4, %s1492_s29), 0  ;;  %p187_p10 = scmp.eq.s32.totalorder %s786_s27, 7 }
  0x18   : > { %1469 = sst [smem:[#allocation19_spill]] %s1494_s29  ;;  %p1249_p8 = por %p72_p6, %p71_p5 }
  0x19   : > { %p1253_p9 = por %p181_p7, %p65_p1  ;;  %s51_s10 = ssub.s32 %s1140_s24, %s1494_s29 }
  0x1a   : > { %s53_s11 = sor.u32 %s52_s6, %s51_s10  ;;  %p1259_p12 = por %p187_p10, %p71_p5 }
  0x1b   : > { %p56_p11 = scmp.eq.s32.totalorder %s53_s11, 0  ;;  %p857_p13 = scmp.lt.s32.totalorder %s1144_s25, 8 }
  0x1c   : > { %s1472_s12 = scalar_select %p1259_p12, 1, 0 }
  0x1d   : > { %s1457_s13 = sand.u32 1, %s1124_s20   ;;  %s791_s16 = sshll.u32 %s1140_s24, 2 }
  0x1e   : > { %1473 = sst [smem:[#allocation20_spill]] %s1472_s12  ;;  %s1270_s15 = sshll.u32 %s1457_s13, 3 }
  0x1f   : > { %s1266_s14 = scalar_select %p56_p11, %s1124_s20, %s58_s30  }
  0x20   : > { %s254_s17 = sadd.s32 %s1136_s23, %s791_s16  ;;  %p1276_p0 = pnand %p857_p13, %p1239_p3 }
  0x21   : > { %1474 = sst [smem:[#allocation21_spill]] %s1266_s14  ;;  %s1280_s6 = sshll.u32 %s254_s17, 7 }
  0x22   : > { %s265_s10 = sand.u32 1, %s1144_s25   ;;  %s1476_s1 = sld [smem:[#allocation22_spill]] }
  0x23   : > { %s269_s13 = scalar_lea.vmem [#allocation5], %s1270_s15  ;;  %p799_p1 = scmp.ge.s32.totalorder %s1144_s25, 1 }
  0x24   : > { %s278_s28 = sshll.u32 %s269_s13, 4  ;;  %p303_p2 = scmp.lt.s32.totalorder %s1144_s25, 9  ;;  %s279_s28 = int_to_ptr.vmem [resolvable:$true] %s278_s28 }
  0x25   : > { %s1290_s7 = scalar_lea.sflag [#allocation6], %s265_s10  ;;  %p932_p3 = pneg %p1276_p0 }
  0x26   : > { %s943_s16 = scalar_lea.vmem %s279_s28, 128  ;;  %s1146_s17 = smov [#allocation5]  }
  0x27   : > { %p944_p4 = scmp.ne.s32.totalorder %s279_s28, %s943_s16  ;;  %s948_s24 = sshll.u32 %s1146_s17, 4  ;;  %s949_s24 = int_to_ptr.vmem [resolvable:$false] %s948_s24 }
  0x28   : > { %s276_s29 = scalar_lea.hbm %s1476_s1, %s1280_s6  ;;  %s950_s11 = scalar_lea.vmem %s949_s24, 256 }
  0x29   : > { %p946_p5 = pnand %p944_p4, %p932_p3  ;;  %p951_p7 = scmp.lt.s32.totalorder %s279_s28, %s949_s24 }
  0x2a   : > { %p952_p10 = scmp.lt.s32.totalorder %s950_s11, %s943_s16 }
  0x2b   : > { %p947_p6 = pneg %p946_p5 }
  0x2c   : > { %p953_p11 = por %p952_p10, %p951_p7 }
  0x2e   : > { %p954_p13 = pnand %p953_p11, %p947_p6 }
  0x30   : > { %957 = shalt.err (!%p954_p13)
}
  0x31   : > { %846 = dma.hbm_to_vmem [thread:$0]  (!%p1276_p0), %s276_s29, 128, %s279_s28, %s1290_s7  }
  0x32   : > { %p1304_p4 = pnand %p799_p1, %p303_p2  ;;  %s256_s30 = scalar_lea.hbm %s1450_s0, %s1280_s6 }
  0x33   : > { %s248_s16 = scalar_lea.vmem [#allocation2], %s1270_s15  ;;  %s296_s23 = scalar_lea.hbm %s1452_s2, %s1280_s6 }
  0x34   : > { %s258_s17 = sshll.u32 %s248_s16, 4  ;;  %s1478_s14 = sand.u32 1, %s1124_s20   ;;  %s259_s17 = int_to_ptr.vmem [resolvable:$true] %s258_s17 }
  0x35   : > { %s245_s12 = scalar_lea.sflag [#allocation3], %s1478_s14  ;;  %s971_s28 = scalar_lea.vmem %s259_s17, 128 }
  0x36   : > { %p972_p5 = scmp.ne.s32.totalorder %s259_s17, %s971_s28  ;;  %s1147_s29 = smov [#allocation2]  }
  0x37   : > { %s976_s18 = sshll.u32 %s1147_s29, 4  ;;  %s977_s18 = int_to_ptr.vmem [resolvable:$false] %s976_s18 }
  0x38   : > { %p974_p1 = pnand %p972_p5, %p932_p3  ;;  %s978_s24 = scalar_lea.vmem %s977_s18, 256 }
  0x39   : > { %p979_p6 = scmp.lt.s32.totalorder %s259_s17, %s977_s18  ;;  %p980_p7 = scmp.lt.s32.totalorder %s978_s24, %s971_s28 }
  0x3a   : > { %p975_p2 = pneg %p974_p1 }
  0x3b   : > { %p981_p10 = por %p980_p7, %p979_p6 }
  0x3d   : > { %p982_p11 = pnand %p981_p10, %p975_p2 }
  0x3f   : > { %985 = shalt.err (!%p982_p11)
}
  0x40   : > { %843 = dma.hbm_to_vmem [thread:$0]  (!%p1276_p0), %s256_s30, 128, %s259_s17, %s245_s12  }
  0x41   : > { %s289_s1 = scalar_lea.vmem [#allocation7], %s1270_s15  ;;  %s1148_s16 = smov [#allocation7]  }
  0x42   : > { %s298_s14 = sshll.u32 %s289_s1, 4  ;;  %s1004_s18 = sshll.u32 %s1148_s16, 4  ;;  %s299_s14 = int_to_ptr.vmem [resolvable:$true] %s298_s14  ;;  %s1005_s18 = int_to_ptr.vmem [resolvable:$false] %s1004_s18 }
  0x43   : > { %s999_s10 = scalar_lea.vmem %s299_s14, 128  ;;  %s1006_s11 = scalar_lea.vmem %s1005_s18, 256 }
  0x44   : > { %p1000_p13 = scmp.ne.s32.totalorder %s299_s14, %s999_s10  ;;  %p1007_p2 = scmp.lt.s32.totalorder %s299_s14, %s1005_s18 }
  0x45   : > { %p1008_p6 = scmp.lt.s32.totalorder %s1006_s11, %s999_s10 }
  0x46   : > { %p1002_p5 = pnand %p1000_p13, %p932_p3 }
  0x47   : > { %p1009_p7 = por %p1008_p6, %p1007_p2 }
  0x48   : > { %p1003_p1 = pneg %p1002_p5 }
  0x4a   : > { %p1010_p10 = pnand %p1009_p7, %p1003_p1 }
  0x4c   : > { %1013 = shalt.err (!%p1010_p10)
}
  0x4d   : > { %849 = dma.hbm_to_vmem [thread:$0]  (!%p1276_p0), %s296_s23, 128, %s299_s14, %s1290_s7  }
  0x4e   : > { %307 = sbr.rel (%p1304_p4) target bundleno = 812 (0x32c), region = 36  ;;  %s1339_s30 = sand.u32 (!%p1304_p4), 1, %s1120_s19  }
  0x4f   : > { %s1342_s17 = sshll.u32 (!%p1304_p4), %s1339_s30, 3  ;;  %s310_s27 = scalar_lea.sflag (!%p1304_p4), [#allocation3], %s1339_s30 }
  0x50   : > { %s313_s28 = scalar_lea.vmem (!%p1304_p4), [#allocation2], %s1342_s17 }
  0x53   : > { %1099 = dma.done.wait (%p1249_p8), %s310_s27, 128  }
  0x54   : > { %1101 = vsyncadd (%p1249_p8), %s310_s27, 4294967168  ;;  %s318_s23 = sand.u32 1, %s1225_s26   ;;  %s322_s7 = scalar_lea.vmem [#allocation5], %s1342_s17 }
  0x55   : > { %s319_s6 = scalar_lea.sflag [#allocation6], %s318_s23 }
  0x56   : > { %1103 = dma.done.wait (%p1249_p8), %s319_s6, 256  }
  0x57   : > { %1105 = vsyncadd (%p1249_p8), %s319_s6, 4294967040  ;;  %v1149_v0 = vmov 0.0   ;;  %vm1150_vm0 = vmmov 0   ;;  %vm388_vm1 = vcmask 261120   ;;  %v384_v1 = vld [vmem:[%s322_s7] sm:$0xff]  ;;  %v383_v2 = vld [vmem:[%s313_s28] sm:$0xff] }
  0x58   : > { %820 = vmatprep.subr.mxu0 %v1149_v0  ;;  %822 = vmatprep.mubr.msk.f32.mxu0 %vm1150_vm0, %v1149_v0  ;;  %v387_v3 = vmul.f32 0.17677669, %v383_v2  ;;  %v386_v4 = vld [vmem:[%s1453_s3] sm:$0x3]  ;;  %v1151_v5 = vmov 0   ;;  %vm470_vm4 = vcmask 64512  }
  0x59   : > { %825 = vmatprep.subr.mxu1 %v1149_v0  ;;  %827 = vmatprep.mubr.msk.f32.mxu1 %vm1150_vm0, %v1149_v0  ;;  %vm465_vm2 = vnez %v386_v4  ;;  %s331_s8 = scalar_lea.vmem [#allocation7], %s1342_s17  ;;  %s376_s29 = scalar_lea.vmem [#allocation9], %s1342_s17 }
  0x5a   : > { %821 = vmatpush3.xpose.msk.msra.mxu0 %vm388_vm1, %v384_v1  ;;  %v466_v6 = vsel %vm465_vm2, 16843009, %v1151_v5  ;;  %v385_v17 = vld [vmem:[%s331_s8] sm:$0xff]  ;;  %s810_s24 = sshll.u32 %s1132_s22, 2  ;;  %s598_s11 = sshll.u32 %s376_s29, 4  ;;  %s599_s11 = int_to_ptr.vmem [resolvable:$true] %s598_s11 }
  0x5b   : > { %v467_v7 = vunpack.c.0.s8 %v466_v6  ;;  %826 = vmatpush3.msra.mxu1 %v385_v17  ;;  %s1369_s1 = sadd.s32 %s1128_s21, %s810_s24  ;;  %s566_s12 = scalar_lea.sflag [#allocation10], %s1339_s30 }
  0x5c   : > { %s811_s14 = sshll.u32 %s1369_s1, 7  ;;  %s1014_s15 = scalar_lea.vmem %s599_s11, 128 }
  0x5d   : > { %823 = vmatmul.mubr.msk.f32.vlgmr.msra.gmra.mxu0 %vm388_vm1, %v387_v3  ;;  %vm468_vm3 = vcmp.ne.s32.totalorder %v467_v7, 0  ;;  %s596_s18 = scalar_lea.hbm %s1455_s5, %s811_s14  ;;  %p1015_p8 = scmp.ne.s32.totalorder %s599_s11, %s1014_s15 }
  0x5e   : > { %s1152_s27 = smov [#allocation9]  }
  0x5f   : > { %p1016_p0 = pnand %p1015_p8, %p1253_p9  ;;  %s1018_s22 = sshll.u32 %s1152_s27, 4  ;;  %s1019_s22 = int_to_ptr.vmem [resolvable:$false] %s1018_s22 }
  0x60   : > { %s1020_s21 = scalar_lea.vmem %s1019_s22, 256  ;;  %p1021_p4 = scmp.lt.s32.totalorder %s599_s11, %s1019_s22 }
  0x61   : > { %p1017_p3 = pneg %p1016_p0  ;;  %p1022_p11 = scmp.lt.s32.totalorder %s1020_s21, %s1014_s15 }
  0x63   : > { %p1023_p13 = por %p1022_p11, %p1021_p4 }
  0x65   : > { %p1024_p5 = pnand %p1023_p13, %p1017_p3 }
 0x11d   : > { %v461_v8 = vpop.f32.mrf.mxu0 }
 0x11e   : > { %v469_v9 = vsel %vm468_vm3, -1e+09, %v461_v8 }
 0x11f   : > { %v824_v10 = vpop.f32.mrf.mxu0  ;;  %v471_v11 = vsel %vm470_vm4, %v469_v9, -inf }
 0x120   : > { %472 = vmax.xlane.f32.xlu0 %v471_v11 }
 0x1a9   : > { %v473_v12 = vpop.xlane.xlu0 %472 }
 0x1aa   : > { %v474_v13 = vsub.f32 %v469_v9, %v473_v12 }
 0x1ac   : > { %v475_v14 = vmul.f32 1.442695, %v474_v13 }
 0x1ae   : > { %926 = vpow2.f32 %v475_v14 }
 0x1bb   : > { %v927_v15 = vpop.eup %926 }
 0x1bc   : > { %v477_v16 = vsel %vm470_vm4, %v927_v15, 0.0 }
 0x1bd   : > { %478 = vadd.xlane.f32.xlu0 %v477_v16 }
 0x246   : > { %v479_v18 = vpop.xlane.xlu0 %478 }
 0x247   : > { %928 = vrcp.f32 %v479_v18 }
 0x254   : > { %v929_v19 = vpop.eup %928 }
 0x255   : > { %v481_v20 = vmul.f32 %v929_v19, %v479_v18 }
 0x257   : > { %v482_v21 = vsub.f32 2.0, %v481_v20 }
 0x259   : > { %v483_v22 = vmul.f32 %v929_v19, %v482_v21 }
 0x25b   : > { %v484_v23 = vmul.f32 %v927_v15, %v483_v22 }
 0x25d   : > { %828 = vmatmul.mubr.msk.f32.vlgmr.msra.gmra.mxu1 %vm470_vm4, %v484_v23  ;;  %485 = vst.msk [vmem:[%s376_s29] sm:$0xff] %vm470_vm4, %v484_v23 }
 0x25e   : > { %1027 = shalt.err (!%p1024_p5)
}
 0x25f   : > { %s1028_s28 = scalar_lea.hbm %s596_s18, 128  ;;  %s1032_s7 = scalar_lea.hbm %s1455_s5, 1024 }
 0x260   : > { %p1029_p1 = scmp.ne.s32.totalorder %s596_s18, %s1028_s28  ;;  %p1033_p7 = scmp.lt.s32.totalorder %s596_s18, %s1455_s5 }
 0x261   : > { %p1034_p10 = scmp.lt.s32.totalorder %s1032_s7, %s1028_s28 }
 0x262   : > { %p1030_p2 = pnand %p1029_p1, %p1253_p9 }
 0x263   : > { %p1035_p8 = por %p1034_p10, %p1033_p7 }
 0x264   : > { %p1031_p6 = pneg %p1030_p2 }
 0x266   : > { %p1036_p0 = pnand %p1035_p8, %p1031_p6 }
 0x268   : > { %1039 = shalt.err (!%p1036_p0)
}
 0x269   : > { %837 = dma.vmem_to_hbm [thread:$0]  (%p1253_p9), %s599_s11, 128, %s596_s18, %s566_s12  }
 0x26a   : > { %s369_s8 = scalar_lea.vmem [#allocation8], %s1342_s17  ;;  %s1396_s16 = scalar_lea.hbm %s1454_s4, %s811_s14 }
 0x26b   : > { %s582_s29 = sshll.u32 %s369_s8, 4  ;;  %s561_s15 = scalar_lea.sflag [#allocation4], %s1339_s30  ;;  %s1398_s29 = int_to_ptr.vmem [resolvable:$true] %s582_s29 }
 0x26c   : > { %s1040_s27 = scalar_lea.vmem %s1398_s29, 128  ;;  %s1153_s17 = smov [#allocation8]  }
 0x26d   : > { %p1041_p3 = scmp.ne.s32.totalorder %s1398_s29, %s1040_s27  ;;  %s1044_s1 = sshll.u32 %s1153_s17, 4  ;;  %s1045_s1 = int_to_ptr.vmem [resolvable:$false] %s1044_s1 }
 0x26e   : > { %s1046_s14 = scalar_lea.vmem %s1045_s1, 256  ;;  %p1047_p13 = scmp.lt.s32.totalorder %s1398_s29, %s1045_s1 }
 0x26f   : > { %p1042_p4 = pnand %p1041_p3, %p1253_p9  ;;  %p1048_p5 = scmp.lt.s32.totalorder %s1046_s14, %s1040_s27 }
 0x271   : > { %p1043_p11 = pneg %p1042_p4  ;;  %p1049_p1 = por %p1048_p5, %p1047_p13 }
 0x273   : > { %p1050_p2 = pnand %p1049_p1, %p1043_p11 }
 0x31d   : > { %v555_v24 = vpop.f32.mrf.mxu1 }
 0x31e   : > { %559 = vst.msk [vmem:[%s369_s8] sm:$0xff] %vm388_vm1, %v555_v24 }
 0x31f   : > { %v829_v25 = vpop.f32.mrf.mxu1 }
 0x320   : > { %1053 = shalt.err (!%p1050_p2)
}
 0x321   : > { %s1054_s18 = scalar_lea.hbm %s1396_s16, 128  ;;  %s1058_s12 = scalar_lea.hbm %s1454_s4, 1024 }
 0x322   : > { %p1055_p6 = scmp.ne.s32.totalorder %s1396_s16, %s1054_s18  ;;  %p1059_p8 = scmp.lt.s32.totalorder %s1396_s16, %s1454_s4 }
 0x323   : > { %p1060_p0 = scmp.lt.s32.totalorder %s1058_s12, %s1054_s18 }
 0x324   : > { %p1056_p7 = pnand %p1055_p6, %p1253_p9 }
 0x325   : > { %p1061_p3 = por %p1060_p0, %p1059_p8 }
 0x326   : > { %p1057_p10 = pneg %p1056_p7 }
 0x328   : > { %p1062_p4 = pnand %p1061_p3, %p1057_p10 }
 0x32a   : > { %1065 = shalt.err (!%p1062_p4)
}
 0x32b   : > { %836 = dma.vmem_to_hbm [thread:$0]  (%p1253_p9), %s1398_s29, 128, %s1396_s16, %s561_s15  }
 0x32c PF: > { %s1479_s28 = sld [smem:[#allocation15_spill]]  ;;  %p858_p11 = scmp.ge.s32.totalorder %s1144_s25, 2 }
 0x32e   : > { %p851_p13 = pnand %p858_p11, %p1259_p12 }
 0x330   : > { %p852_p5 = pneg %p851_p13 }
 0x332   : > { %s610_s6 = sand.u32 1, %s1479_s28  }
 0x333   : > { %s611_s7 = scalar_lea.sflag [#allocation4], %s610_s6 }
 0x334   : > { %1107 = dma.done.wait (%p852_p5), %s611_s7, 128  }
 0x335   : > { %1109 = vsyncadd (%p852_p5), %s611_s7, 4294967168  ;;  %s620_s26 = scalar_lea.sflag [#allocation10], %s610_s6 }
 0x336   : > { %1111 = dma.done.wait (%p852_p5), %s620_s26, 128  }
 0x337   : > { %1113 = vsyncadd (%p852_p5), %s620_s26, 4294967168  ;;  %s28_s25 = sadd.s32 1, %s1144_s25   ;;  %s1481_s9 = sld [smem:[#allocation21_spill]] }
 0x338   : > { %p25_p1 = scmp.ge.s32.totalorder %s28_s25, 10   ;;  %s1482_s21 = sld [smem:[#allocation16_spill]] }
 0x339   : > { %s1483_s22 = sld [smem:[#allocation17_spill]]  ;;  %s1486_s18 = smov %s1120_s19 }
 0x33a   : > { %s1484_s23 = sld [smem:[#allocation18_spill]]  ;;  %s1487_s19 = smov %s1124_s20 }
 0x33b   : > { %s1485_s24 = sld [smem:[#allocation19_spill]]  ;;  %27 = sbr.rel (!%p25_p1) target bundleno = 13 (0xd), region = 125 }
 0x33d   : > { %s1488_s20 = smov %s1481_s9 }
 0x340   :  { %625 = vsyncpa [#allocation3], 1 }
 0x341   :  { %627 = vsyncpa [#allocation3 + $0x1], 1 }
 0x342   :  { %628 = vsyncpa [#allocation6], 1 }
 0x343   :  { %630 = vsyncpa [#allocation6 + $0x1], 1 }
 0x344   :  { %631 = vsyncpa [#allocation4], 1 }
 0x345   :  { %633 = vsyncpa [#allocation4 + $0x1], 1 }
 0x346   :  { %634 = vsyncpa [#allocation10], 1 }
 0x347   :  { %636 = vsyncpa [#allocation10 + $0x1], 1 }

</bundles_post_ra>
